<compile_context>
chip_gen: v5e
topology: v5e:2x2
jax: 0.10.0
libtpu: 0.0.40
codegen_flags: <defaults>
</compile_context>

<pallas_src>
import jax
import jax.numpy as jnp
from jax.experimental import pallas as pl
from jax.experimental.pallas import tpu as pltpu

F32 = jnp.float32


# ----------------------------------------------------------------------------
# Kernels
# ----------------------------------------------------------------------------

def _readout_median_kernel(seq_ref, out_ref):
    """out[b, h] = lower median over nodes of seq[b, :, h] (torch.median)."""
    seq = seq_ref[...]                                     # (B, N, Hblk)
    n = seq.shape[1]
    k = (n - 1) // 2                                       # torch's lower median index
    row = jax.lax.broadcasted_iota(jnp.int32, seq.shape, 1)
    # Stable rank of each row within its (b, h) column:
    #   rank_i = #{j : x_j < x_i} + #{j < i : x_j == x_i}
    # Ranks form a permutation 0..n-1, so exactly one row has rank == k and it
    # is the k-th order statistic.  All passes are whole-block VPU ops.
    rank = jnp.zeros(seq.shape, jnp.int32)
    for j in range(n):
        xj = seq[:, j:j + 1, :]                            # (B, 1, Hblk) sublane slice
        lt = (xj < seq).astype(jnp.int32)
        eq = ((xj == seq) & (row > j)).astype(jnp.int32)
        rank = rank + lt + eq
    sel = rank == k                                        # exactly one True per column
    out_ref[...] = jnp.sum(jnp.where(sel, seq, 0.0), axis=1)


def _readout_mean_kernel(seq_ref, msk_ref, out_ref):
    """out = mean(seq * msk[..., None], axis=1) / sum(msk)  (literal torch semantics)."""
    seq = seq_ref[...]                                     # (B, N, Hblk)
    msk = msk_ref[...]                                     # (B, N)
    w = msk[:, :, None]
    out_ref[...] = jnp.mean(seq * w, axis=1) / jnp.sum(msk)


# ----------------------------------------------------------------------------
# Wrapper
# ----------------------------------------------------------------------------

def readout_forward(seq, msk=None, *, h_block=512):
    """Pallas Readout.forward.  seq: (B, N, H) float32, msk: (B, N) or None."""
    B, N, H = seq.shape
    seq = seq.astype(F32)

    # Lane-dense feature tiling: multiples of 128 lanes when H is large,
    # otherwise a single full block (block == full array dims is always legal).
    if H > h_block and H % h_block == 0 and h_block % 128 == 0:
        hb = h_block
    else:
        hb = H
    grid = (H // hb,)

    seq_spec = pl.BlockSpec((B, N, hb), lambda h: (0, 0, h))
    out_spec = pl.BlockSpec((B, hb), lambda h: (0, h))
    out_shape = jax.ShapeDtypeStruct((B, H), F32)
    cparams = pltpu.CompilerParams(dimension_semantics=("parallel",))

    if msk is None:
        return pl.pallas_call(
            _readout_median_kernel,
            out_shape=out_shape,
            grid=grid,
            in_specs=[seq_spec],
            out_specs=out_spec,
            compiler_params=cparams,
        )(seq)

    msk = msk.astype(F32)
    msk_spec = pl.BlockSpec((B, N), lambda h: (0, 0))      # full mask for every block
    return pl.pallas_call(
        _readout_mean_kernel,
        out_shape=out_shape,
        grid=grid,
        in_specs=[seq_spec, msk_spec],
        out_specs=out_spec,
        compiler_params=cparams,
    )(seq, msk)


# ----------------------------------------------------------------------------
# Main
# ----------------------------------------------------------------------------

if __name__ == "__main__":
    key = jax.random.PRNGKey(0)
    k1, k2, k3, k4 = jax.random.split(key, 4)

    # Case 1: even node count, feature axis tiled into two 128-lane blocks.
    B, N, H = 4, 8, 256
    seq = jax.random.normal(k1, (B, N, H), F32)
    msk = jax.random.uniform(k2, (B, N), dtype=F32) + 0.5

    r_med = readout_forward(seq, None, h_block=128)
    r_mean = readout_forward(seq, msk, h_block=128)
    jax.block_until_ready((r_med, r_mean))

    ref_med = jnp.sort(seq, axis=1)[:, (N - 1) // 2, :]        # torch lower median
    ref_mean = jnp.mean(seq * msk[:, :, None], axis=1) / jnp.sum(msk)
    assert r_med.shape == (B, H) and r_mean.shape == (B, H)
    assert bool(jnp.allclose(r_med, ref_med, rtol=1e-5, atol=1e-5))
    assert bool(jnp.allclose(r_mean, ref_mean, rtol=1e-5, atol=1e-5))

    # Case 2: odd node count with duplicate values (stresses the median
    # tie-breaking) in a single feature block.
    B2, N2, H2 = 2, 5, 128
    seq2 = jnp.round(jax.random.normal(k3, (B2, N2, H2), F32))  # many exact ties
    msk2 = jax.random.uniform(k4, (B2, N2), dtype=F32) + 0.5

    r_med2 = readout_forward(seq2, None)
    r_mean2 = readout_forward(seq2, msk2)
    jax.block_until_ready((r_med2, r_mean2))

    ref_med2 = jnp.sort(seq2, axis=1)[:, (N2 - 1) // 2, :]
    ref_mean2 = jnp.mean(seq2 * msk2[:, :, None], axis=1) / jnp.sum(msk2)
    assert bool(jnp.allclose(r_med2, ref_med2, rtol=1e-5, atol=1e-5))
    assert bool(jnp.allclose(r_mean2, ref_mean2, rtol=1e-5, atol=1e-5))

    print("KERNEL_OK")
</pallas_src>

<mosaic_0001>
module attributes {stable_mosaic.version = 11 : i64} {
  func.func @_readout_median_kernel(%arg0: i32, %arg1: memref<4x8x128xf32, #tpu.memory_space<vmem>>, %arg2: memref<4x128xf32, #tpu.memory_space<vmem>>) attributes {dimension_semantics = [#tpu.dimension_semantics<parallel>], iteration_bounds = array<i64: 2>, scalar_prefetch = 0 : i64, scratch_operands = 0 : i64, tpu.core_type = #tpu.core_type<tc>, window_params = [{transform_indices = @transform_0, window_bounds = array<i64: 4, 8, 128>}, {transform_indices = @transform_1, window_bounds = array<i64: 4, 128>}]} {
    %c0 = arith.constant 0 : index
    %c0_0 = arith.constant 0 : index
    %c0_1 = arith.constant 0 : index
    %0 = vector.load %arg1[%c0, %c0_0, %c0_1] : memref<4x8x128xf32, #tpu.memory_space<vmem>>, vector<4x8x128xf32>
    %1 = tpu.iota {dimensions = array<i32: 1>} : vector<4x8x128xi32>
    %c0_i32 = arith.constant 0 : i32
    %2 = vector.broadcast %c0_i32 : i32 to vector<4x8x128xi32>
    %3 = vector.extract_strided_slice %0 {offsets = [0, 0, 0], sizes = [4, 1, 128], strides = [1, 1, 1]} : vector<4x8x128xf32> to vector<4x1x128xf32>
    %4 = vector.broadcast %3 : vector<4x1x128xf32> to vector<4x8x128xf32>
    %5 = arith.cmpf olt, %4, %0 : vector<4x8x128xf32>
    %6 = arith.extui %5 : vector<4x8x128xi1> to vector<4x8x128xi32>
    %7 = vector.broadcast %3 : vector<4x1x128xf32> to vector<4x8x128xf32>
    %8 = arith.cmpf oeq, %7, %0 : vector<4x8x128xf32>
    %c0_i32_2 = arith.constant 0 : i32
    %9 = vector.broadcast %c0_i32_2 : i32 to vector<4x8x128xi32>
    %10 = arith.cmpi sgt, %1, %9 : vector<4x8x128xi32>
    %11 = arith.andi %8, %10 : vector<4x8x128xi1>
    %12 = arith.extui %11 : vector<4x8x128xi1> to vector<4x8x128xi32>
    %13 = arith.addi %2, %6 : vector<4x8x128xi32>
    %14 = arith.addi %13, %12 : vector<4x8x128xi32>
    %15 = vector.extract_strided_slice %0 {offsets = [0, 1, 0], sizes = [4, 1, 128], strides = [1, 1, 1]} : vector<4x8x128xf32> to vector<4x1x128xf32>
    %16 = vector.broadcast %15 : vector<4x1x128xf32> to vector<4x8x128xf32>
    %17 = arith.cmpf olt, %16, %0 : vector<4x8x128xf32>
    %18 = arith.extui %17 : vector<4x8x128xi1> to vector<4x8x128xi32>
    %19 = vector.broadcast %15 : vector<4x1x128xf32> to vector<4x8x128xf32>
    %20 = arith.cmpf oeq, %19, %0 : vector<4x8x128xf32>
    %c1_i32 = arith.constant 1 : i32
    %21 = vector.broadcast %c1_i32 : i32 to vector<4x8x128xi32>
    %22 = arith.cmpi sgt, %1, %21 : vector<4x8x128xi32>
    %23 = arith.andi %20, %22 : vector<4x8x128xi1>
    %24 = arith.extui %23 : vector<4x8x128xi1> to vector<4x8x128xi32>
    %25 = arith.addi %14, %18 : vector<4x8x128xi32>
    %26 = arith.addi %25, %24 : vector<4x8x128xi32>
    %27 = vector.extract_strided_slice %0 {offsets = [0, 2, 0], sizes = [4, 1, 128], strides = [1, 1, 1]} : vector<4x8x128xf32> to vector<4x1x128xf32>
    %28 = vector.broadcast %27 : vector<4x1x128xf32> to vector<4x8x128xf32>
    %29 = arith.cmpf olt, %28, %0 : vector<4x8x128xf32>
    %30 = arith.extui %29 : vector<4x8x128xi1> to vector<4x8x128xi32>
    %31 = vector.broadcast %27 : vector<4x1x128xf32> to vector<4x8x128xf32>
    %32 = arith.cmpf oeq, %31, %0 : vector<4x8x128xf32>
    %c2_i32 = arith.constant 2 : i32
    %33 = vector.broadcast %c2_i32 : i32 to vector<4x8x128xi32>
    %34 = arith.cmpi sgt, %1, %33 : vector<4x8x128xi32>
    %35 = arith.andi %32, %34 : vector<4x8x128xi1>
    %36 = arith.extui %35 : vector<4x8x128xi1> to vector<4x8x128xi32>
    %37 = arith.addi %26, %30 : vector<4x8x128xi32>
    %38 = arith.addi %37, %36 : vector<4x8x128xi32>
    %39 = vector.extract_strided_slice %0 {offsets = [0, 3, 0], sizes = [4, 1, 128], strides = [1, 1, 1]} : vector<4x8x128xf32> to vector<4x1x128xf32>
    %40 = vector.broadcast %39 : vector<4x1x128xf32> to vector<4x8x128xf32>
    %41 = arith.cmpf olt, %40, %0 : vector<4x8x128xf32>
    %42 = arith.extui %41 : vector<4x8x128xi1> to vector<4x8x128xi32>
    %43 = vector.broadcast %39 : vector<4x1x128xf32> to vector<4x8x128xf32>
    %44 = arith.cmpf oeq, %43, %0 : vector<4x8x128xf32>
    %c3_i32 = arith.constant 3 : i32
    %45 = vector.broadcast %c3_i32 : i32 to vector<4x8x128xi32>
    %46 = arith.cmpi sgt, %1, %45 : vector<4x8x128xi32>
    %47 = arith.andi %44, %46 : vector<4x8x128xi1>
    %48 = arith.extui %47 : vector<4x8x128xi1> to vector<4x8x128xi32>
    %49 = arith.addi %38, %42 : vector<4x8x128xi32>
    %50 = arith.addi %49, %48 : vector<4x8x128xi32>
    %51 = vector.extract_strided_slice %0 {offsets = [0, 4, 0], sizes = [4, 1, 128], strides = [1, 1, 1]} : vector<4x8x128xf32> to vector<4x1x128xf32>
    %52 = vector.broadcast %51 : vector<4x1x128xf32> to vector<4x8x128xf32>
    %53 = arith.cmpf olt, %52, %0 : vector<4x8x128xf32>
    %54 = arith.extui %53 : vector<4x8x128xi1> to vector<4x8x128xi32>
    %55 = vector.broadcast %51 : vector<4x1x128xf32> to vector<4x8x128xf32>
    %56 = arith.cmpf oeq, %55, %0 : vector<4x8x128xf32>
    %c4_i32 = arith.constant 4 : i32
    %57 = vector.broadcast %c4_i32 : i32 to vector<4x8x128xi32>
    %58 = arith.cmpi sgt, %1, %57 : vector<4x8x128xi32>
    %59 = arith.andi %56, %58 : vector<4x8x128xi1>
    %60 = arith.extui %59 : vector<4x8x128xi1> to vector<4x8x128xi32>
    %61 = arith.addi %50, %54 : vector<4x8x128xi32>
    %62 = arith.addi %61, %60 : vector<4x8x128xi32>
    %63 = vector.extract_strided_slice %0 {offsets = [0, 5, 0], sizes = [4, 1, 128], strides = [1, 1, 1]} : vector<4x8x128xf32> to vector<4x1x128xf32>
    %64 = vector.broadcast %63 : vector<4x1x128xf32> to vector<4x8x128xf32>
    %65 = arith.cmpf olt, %64, %0 : vector<4x8x128xf32>
    %66 = arith.extui %65 : vector<4x8x128xi1> to vector<4x8x128xi32>
    %67 = vector.broadcast %63 : vector<4x1x128xf32> to vector<4x8x128xf32>
    %68 = arith.cmpf oeq, %67, %0 : vector<4x8x128xf32>
    %c5_i32 = arith.constant 5 : i32
    %69 = vector.broadcast %c5_i32 : i32 to vector<4x8x128xi32>
    %70 = arith.cmpi sgt, %1, %69 : vector<4x8x128xi32>
    %71 = arith.andi %68, %70 : vector<4x8x128xi1>
    %72 = arith.extui %71 : vector<4x8x128xi1> to vector<4x8x128xi32>
    %73 = arith.addi %62, %66 : vector<4x8x128xi32>
    %74 = arith.addi %73, %72 : vector<4x8x128xi32>
    %75 = vector.extract_strided_slice %0 {offsets = [0, 6, 0], sizes = [4, 1, 128], strides = [1, 1, 1]} : vector<4x8x128xf32> to vector<4x1x128xf32>
    %76 = vector.broadcast %75 : vector<4x1x128xf32> to vector<4x8x128xf32>
    %77 = arith.cmpf olt, %76, %0 : vector<4x8x128xf32>
    %78 = arith.extui %77 : vector<4x8x128xi1> to vector<4x8x128xi32>
    %79 = vector.broadcast %75 : vector<4x1x128xf32> to vector<4x8x128xf32>
    %80 = arith.cmpf oeq, %79, %0 : vector<4x8x128xf32>
    %c6_i32 = arith.constant 6 : i32
    %81 = vector.broadcast %c6_i32 : i32 to vector<4x8x128xi32>
    %82 = arith.cmpi sgt, %1, %81 : vector<4x8x128xi32>
    %83 = arith.andi %80, %82 : vector<4x8x128xi1>
    %84 = arith.extui %83 : vector<4x8x128xi1> to vector<4x8x128xi32>
    %85 = arith.addi %74, %78 : vector<4x8x128xi32>
    %86 = arith.addi %85, %84 : vector<4x8x128xi32>
    %87 = vector.extract_strided_slice %0 {offsets = [0, 7, 0], sizes = [4, 1, 128], strides = [1, 1, 1]} : vector<4x8x128xf32> to vector<4x1x128xf32>
    %88 = vector.broadcast %87 : vector<4x1x128xf32> to vector<4x8x128xf32>
    %89 = arith.cmpf olt, %88, %0 : vector<4x8x128xf32>
    %90 = arith.extui %89 : vector<4x8x128xi1> to vector<4x8x128xi32>
    %91 = vector.broadcast %87 : vector<4x1x128xf32> to vector<4x8x128xf32>
    %92 = arith.cmpf oeq, %91, %0 : vector<4x8x128xf32>
    %c7_i32 = arith.constant 7 : i32
    %93 = vector.broadcast %c7_i32 : i32 to vector<4x8x128xi32>
    %94 = arith.cmpi sgt, %1, %93 : vector<4x8x128xi32>
    %95 = arith.andi %92, %94 : vector<4x8x128xi1>
    %96 = arith.extui %95 : vector<4x8x128xi1> to vector<4x8x128xi32>
    %97 = arith.addi %86, %90 : vector<4x8x128xi32>
    %98 = arith.addi %97, %96 : vector<4x8x128xi32>
    %c3_i32_3 = arith.constant 3 : i32
    %99 = vector.broadcast %c3_i32_3 : i32 to vector<4x8x128xi32>
    %100 = arith.cmpi eq, %98, %99 : vector<4x8x128xi32>
    %cst = arith.constant 0.000000e+00 : f32
    %101 = vector.broadcast %cst : f32 to vector<4x8x128xf32>
    %102 = arith.select %100, %0, %101 : vector<4x8x128xi1>, vector<4x8x128xf32>
    %cst_4 = arith.constant dense<0.000000e+00> : vector<4x128xf32>
    %103 = vector.multi_reduction <add>, %102, %cst_4 [1] : vector<4x8x128xf32> to vector<4x128xf32>
    %c0_5 = arith.constant 0 : index
    %c0_6 = arith.constant 0 : index
    %104 = vector.load %arg2[%c0_5, %c0_6] : memref<4x128xf32, #tpu.memory_space<vmem>>, vector<4x128xf32>
    tpu.vector_store %arg2[%c0_5, %c0_6], %103 {strides = array<i32>} : memref<4x128xf32, #tpu.memory_space<vmem>>, vector<4x128xf32>,
    return
  }
  func.func @transform_0(%arg0: i32) -> (i32, i32, i32) {
    %c0_i32 = arith.constant 0 : i32
    %c0_i32_0 = arith.constant 0 : i32
    %c0_i32_1 = arith.constant 0 : i32
    return %c0_i32, %c0_i32_0, %arg0 : i32, i32, i32
  }
  func.func @transform_1(%arg0: i32) -> (i32, i32) {
    %c0_i32 = arith.constant 0 : i32
    %c0_i32_0 = arith.constant 0 : i32
    return %c0_i32, %arg0 : i32, i32
  }
}

</mosaic_0001>

<bundles_post_ra>
// kernel: tpu_custom_call.1
= control target key start
LH: loop header
LB: loop body
LE: loop exit
PB: predicated region body
PF: predicated region fallthrough
CT: control target
= control target key end

     0   :  { %6 = vsyncpa [#allocation3], 0  ;;  %s1073_s0 = inlined_call_operand.hbm [shape: f32[4,8,256], index: 0, kind: input, shape index: {}]   ;;  %s1074_s1 = inlined_call_operand.hbm [shape: f32[4,256], index: 1, kind: output, shape index: {}]  }
   0x1   :  { %8 = vsyncpa [#allocation3 + $0x1], 0 }
   0x2   :  { %9 = vsyncpa [#allocation4], 0 }
   0x3   :  { %11 = vsyncpa [#allocation4 + $0x1], 0  ;;  %s706_s6 = smov 0   ;;  %s708_s7 = smov 0  }
   0x4   :  { %s710_s8 = smov 0   ;;  %s712_s9 = smov 0  }
   0x5 LB: > { %s727_s10 = sadd.s32 4294967295, %s690_s9   ;;  %s532_s11 = sadd.s32 4294967294, %s690_s9   ;;  %s690_s9 = sphi %s712_s9, %s1087_s9   ;;  %s686_s8 = sphi %s710_s8, %s1086_s8   ;;  %s682_s7 = sphi %s708_s7, %s1085_s7   ;;  %s678_s6 = sphi %s706_s6, %s1084_s6  }
   0x6   : > { %s731_s12 = sadd.s32 1, %s690_s9   ;;  %s24_s13 = sadd.s32 1, %s686_s8 }
   0x7   : > { %s21_s14 = ssub.s32 %s690_s9, %s731_s12  ;;  %p31_p0 = scmp.ne.s32.totalorder %s686_s8, %s682_s7 }
   0x8   : > { %p22_p1 = scmp.eq.s32.totalorder %s21_s14, 0  ;;  %p32_p2 = scmp.eq.s32.totalorder %s690_s9, 0 }
   0x9   : > { %p37_p3 = scmp.ne.s32.totalorder %s682_s7, %s678_s6  ;;  %p38_p4 = scmp.eq.s32.totalorder %s727_s10, 0 }
   0xa   : > { %s743_s15 = scalar_select %p22_p1, %s686_s8, %s24_s13  }
   0xb   : > { %p745_p5 = por %p32_p2, %p31_p0  ;;  %p749_p6 = por %p38_p4, %p37_p3 }
   0xc   : > { %p61_p7 = scmp.eq.s32.totalorder %s727_s10, 1  ;;  %p67_p8 = scmp.eq.s32.totalorder %s532_s11, 1 }
   0xd   : > { %p534_p9 = scmp.ge.s32.totalorder %s690_s9, 2  ;;  %p556_p10 = scmp.lt.s32.totalorder %s690_s9, 2 }
   0xe   : > { %p756_p11 = por %p61_p7, %p31_p0  ;;  %p760_p12 = por %p67_p8, %p37_p3 }
   0xf   : > { %s87_s20 = sand.u32 1, %s686_s8   ;;  %s536_s21 = sshll.u32 %s690_s9, 3 }
  0x10   : > { %s535_s22 = sshll.u32 %s87_s20, 5  ;;  %s95_s25 = scalar_lea.hbm %s1073_s0, %s536_s21 }
  0x11   : > { %s96_s26 = sshll.u32 %s95_s25, 4  ;;  %s91_s27 = scalar_lea.vmem [#allocation2], %s535_s22  ;;  %s97_s26 = int_to_ptr.hbm [resolvable:$true] %s96_s26 }
  0x12   : > { %s98_s28 = sshll.u32 %s91_s27, 4  ;;  %p771_p13 = pnand %p556_p10, %p745_p5  ;;  %s99_s28 = int_to_ptr.vmem [resolvable:$true] %s98_s28 }
  0x13   : > { %p537_p0 = scmp.ge.s32.totalorder %s690_s9, 1  ;;  %s88_s30 = scalar_lea.sflag [#allocation3], %s87_s20 }
  0x14   : > { %s594_s2 = sshra.s32 %s97_s26, 4  ;;  %p598_p2 = pneg %p771_p13  ;;  %s595_s2 = int_to_ptr.hbm [resolvable:$true] %s594_s2 }
  0x15   : > { %s596_s3 = scalar_lea.hbm %s595_s2, 32  ;;  %s601_s11 = scalar_lea.hbm %s1073_s0, 64 }
  0x16   : > { %p597_p1 = scmp.ne.s32.totalorder %s595_s2, %s596_s3  ;;  %p602_p5 = scmp.lt.s32.totalorder %s595_s2, %s1073_s0 }
  0x17   : > { %p603_p7 = scmp.lt.s32.totalorder %s601_s11, %s596_s3 }
  0x18   : > { %p599_p3 = pnand %p598_p2, %p597_p1 }
  0x19   : > { %p604_p8 = por %p603_p7, %p602_p5 }
  0x1a   : > { %p600_p4 = pneg %p599_p3 }
  0x1c   : > { %p605_p10 = pnand %p604_p8, %p600_p4 }
  0x1e   : > { %608 = shalt.err (!%p605_p10)
}
  0x1f   : > { %s692_s16 = smov 256   ;;  %s693_s20 = smov 128  }
  0x20   : > { %s694_s21 = smov 8   ;;  %p106_p1 = scmp.lt.s32.totalorder %s690_s9, 3 }
  0x21   : > { %551 = dma.hbm_to_vmem [thread:$0]  (!%p771_p13), %s97_s26, 512, %s99_s28, %s88_s30, %s692_s16, %s693_s20, %s694_s21  }
  0x22   : > { %p107_p2 = pnand %p537_p0, %p106_p1 }
  0x23   : > { %s790_s22 = sand.u32 (!%p107_p2), 1, %s682_s7  }
  0x24   : > { %110 = sbr.rel (%p107_p2) target bundleno = 118 (0x76), region = 24  ;;  %s538_s23 = sshll.u32 (!%p107_p2), %s790_s22, 5 }
  0x25   : > { %s113_s24 = scalar_lea.sflag (!%p107_p2), [#allocation3], %s790_s22  ;;  %s116_s25 = scalar_lea.vmem (!%p107_p2), [#allocation2], %s538_s23 }
  0x29   : > { %669 = dma.done.wait (%p749_p6), %s113_s24, 512  }
  0x2a   : > { %671 = vsyncadd (%p749_p6), %s113_s24, 4294966784  ;;  %v140_v0 = vlaneseq  ;;  %v800_v2 = vld [vmem:[%s116_s25] sm:$0xff]  ;;  %v802_v3 = vld [vmem:[%s116_s25 + $0x8] sm:$0xff]  ;;  %v695_v14 = vmov 0   ;;  %s539_s17 = sshll.u32 %s790_s22, 2  ;;  %s541_s26 = sshll.u32 %s727_s10, 2 }
  0x2b   : > { %v804_v4 = vld [vmem:[%s116_s25 + $0x10] sm:$0xff]  ;;  %v808_v5 = vld [vmem:[%s116_s25 + $0x18] sm:$0xff]  ;;  %v142_v6 = vperm.slane %v800_v2, 0  ;;  %v143_v7 = vperm.slane %v802_v3, 0  ;;  %v171_v9 = vperm.slane %v800_v2, 1  ;;  %v172_v11 = vperm.slane %v802_v3, 1  ;;  %s457_s29 = scalar_lea.hbm %s1074_s1, %s541_s26 }
  0x2c   : > { %v798_v1 = vshrl.u32 %v140_v0, 7  ;;  %v144_v8 = vperm.slane %v804_v4, 0  ;;  %v145_v10 = vperm.slane %v808_v5, 0  ;;  %v173_v12 = vperm.slane %v804_v4, 1  ;;  %s135_s10 = scalar_lea.vmem [#allocation5], %s539_s17  ;;  %s461_s2 = sshll.u32 %s457_s29, 4  ;;  %s462_s2 = int_to_ptr.hbm [resolvable:$true] %s461_s2 }
  0x2d   : > { %v174_v13 = vperm.slane %v808_v5, 1  ;;  %vm146_vm2 = vcmp.lt.f32.partialorder %v142_v6, %v800_v2  ;;  %vm147_vm3 = vcmp.lt.f32.partialorder %v143_v7, %v802_v3  ;;  %vm154_vm5 = vcmp.eq.f32.partialorder %v142_v6, %v800_v2  ;;  %s459_s30 = sshll.u32 %s135_s10, 4  ;;  %s447_s3 = scalar_lea.sflag [#allocation4], %s790_s22  ;;  %s460_s30 = int_to_ptr.vmem [resolvable:$true] %s459_s30 }
  0x2e   : > { %vm158_vm0 = vcmp.gt.s32.totalorder %v798_v1, 0  ;;  %vm187_vm1 = vcmp.gt.s32.totalorder %v798_v1, 1  ;;  %vm148_vm4 = vcmp.lt.f32.partialorder %v144_v8, %v804_v4  ;;  %vm149_vm6 = vcmp.lt.f32.partialorder %v145_v10, %v808_v5  ;;  %s638_s4 = sshra.s32 %s462_s2, 4  ;;  %s644_s14 = scalar_lea.hbm %s1074_s1, 8  ;;  %s639_s4 = int_to_ptr.hbm [resolvable:$true] %s638_s4 }
  0x2f   : > { %v150_v15 = vsel %vm146_vm2, 1, %v695_v14  ;;  %v151_v16 = vsel %vm147_vm3, 1, %v695_v14  ;;  %v152_v17 = vsel %vm148_vm4, 1, %v695_v14  ;;  %vm159_vm7 = vmand %vm154_vm5, %vm158_vm0  ;;  %v153_v18 = vsel %vm149_vm6, 1, %v695_v14  ;;  %s640_s5 = scalar_lea.hbm %s639_s4, 4  ;;  %p645_p3 = scmp.lt.s32.totalorder %s639_s4, %s1074_s1 }
  0x30   : > { %vm155_vm8 = vcmp.eq.f32.partialorder %v143_v7, %v802_v3  ;;  %vm156_vm9 = vcmp.eq.f32.partialorder %v144_v8, %v804_v4  ;;  %vm157_vm10 = vcmp.eq.f32.partialorder %v145_v10, %v808_v5  ;;  %v163_v19 = vsel %vm159_vm7, 1, %v695_v14  ;;  %p641_p6 = scmp.ne.s32.totalorder %s639_s4, %s640_s5  ;;  %p646_p4 = scmp.lt.s32.totalorder %s644_s14, %s640_s5 }
  0x31   : > { %vm160_vm11 = vmand %vm155_vm8, %vm158_vm0  ;;  %vm175_vm12 = vcmp.lt.f32.partialorder %v171_v9, %v800_v2  ;;  %vm176_vm13 = vcmp.lt.f32.partialorder %v172_v11, %v802_v3  ;;  %vm177_vm14 = vcmp.lt.f32.partialorder %v173_v12, %v804_v4  ;;  %vm220_vm15 = vcmp.gt.s32.totalorder %v798_v1, 2 }
  0x32   : > { %vm161_vm2 = vmand %vm156_vm9, %vm158_vm0  ;;  %v164_v20 = vsel %vm160_vm11, 1, %v695_v14  ;;  %v167_v21 = vadd.s32 %v163_v19, %v150_v15  ;;  %vm178_vm3 = vcmp.lt.f32.partialorder %v174_v13, %v808_v5  ;;  %v179_v22 = vsel %vm175_vm12, 1, %v695_v14  ;;  %p642_p13 = pnand %p641_p6, %p756_p11  ;;  %p647_p5 = por %p646_p4, %p645_p3 }
  0x33   : > { %vm162_vm4 = vmand %vm157_vm10, %vm158_vm0  ;;  %v165_v23 = vsel %vm161_vm2, 1, %v695_v14  ;;  %v168_v24 = vadd.s32 %v164_v20, %v151_v16  ;;  %v180_v25 = vsel %vm176_vm13, 1, %v695_v14  ;;  %v181_v26 = vsel %vm177_vm14, 1, %v695_v14 }
  0x34   : > { %v166_v27 = vsel %vm162_vm4, 1, %v695_v14  ;;  %v169_v28 = vadd.s32 %v165_v23, %v152_v17  ;;  %v182_v29 = vsel %vm178_vm3, 1, %v695_v14  ;;  %vm183_vm5 = vcmp.eq.f32.partialorder %v171_v9, %v800_v2  ;;  %p643_p0 = pneg %p642_p13 }
  0x35   : > { %v170_v30 = vadd.s32 %v166_v27, %v153_v18  ;;  %vm184_vm6 = vcmp.eq.f32.partialorder %v172_v11, %v802_v3  ;;  %vm185_vm7 = vcmp.eq.f32.partialorder %v173_v12, %v804_v4  ;;  %vm186_vm0 = vcmp.eq.f32.partialorder %v174_v13, %v808_v5  ;;  %vm188_vm8 = vmand %vm183_vm5, %vm187_vm1 }
  0x36   : > { %vm189_vm9 = vmand %vm184_vm6, %vm187_vm1  ;;  %v192_v31 = vsel %vm188_vm8, 1, %v695_v14  ;;  %v196_v32 = vadd.s32 %v179_v22, %v167_v21  ;;  %v197_v33 = vadd.s32 %v180_v25, %v168_v24  ;;  %v198_v34 = vadd.s32 %v181_v26, %v169_v28  ;;  %p648_p7 = pnand %p647_p5, %p643_p0 }
  0x37   : > { %vm190_vm10 = vmand %vm185_vm7, %vm187_vm1  ;;  %v193_v35 = vsel %vm189_vm9, 1, %v695_v14  ;;  %v199_v36 = vadd.s32 %v182_v29, %v170_v30  ;;  %v204_v37 = vperm.slane %v800_v2, 2  ;;  %v205_v38 = vperm.slane %v802_v3, 2 }
  0x38   : > { %vm191_vm11 = vmand %vm186_vm0, %vm187_vm1  ;;  %v194_v39 = vsel %vm190_vm10, 1, %v695_v14  ;;  %v200_v40 = vadd.s32 %v196_v32, %v192_v31  ;;  %v201_v41 = vadd.s32 %v197_v33, %v193_v35  ;;  %v206_v42 = vperm.slane %v804_v4, 2 }
  0x39   : > { %vm253_vm12 = vcmp.gt.s32.totalorder %v798_v1, 3  ;;  %v195_v43 = vsel %vm191_vm11, 1, %v695_v14  ;;  %v202_v44 = vadd.s32 %v198_v34, %v194_v39  ;;  %v207_v45 = vperm.slane %v808_v5, 2 }
  0x3a   : > { %vm208_vm13 = vcmp.lt.f32.partialorder %v204_v37, %v800_v2  ;;  %v203_v46 = vadd.s32 %v199_v36, %v195_v43  ;;  %vm209_vm14 = vcmp.lt.f32.partialorder %v205_v38, %v802_v3  ;;  %vm210_vm1 = vcmp.lt.f32.partialorder %v206_v42, %v804_v4 }
  0x3b   : > { %v212_v47 = vsel %vm208_vm13, 1, %v695_v14  ;;  %vm211_vm2 = vcmp.lt.f32.partialorder %v207_v45, %v808_v5  ;;  %v213_v48 = vsel %vm209_vm14, 1, %v695_v14  ;;  %v214_v49 = vsel %vm210_vm1, 1, %v695_v14 }
  0x3c   : > { %vm216_vm3 = vcmp.eq.f32.partialorder %v204_v37, %v800_v2  ;;  %v215_v50 = vsel %vm211_vm2, 1, %v695_v14  ;;  %vm217_vm4 = vcmp.eq.f32.partialorder %v205_v38, %v802_v3  ;;  %vm218_vm5 = vcmp.eq.f32.partialorder %v206_v42, %v804_v4 }
  0x3d   : > { %vm219_vm6 = vcmp.eq.f32.partialorder %v207_v45, %v808_v5  ;;  %vm221_vm7 = vmand %vm216_vm3, %vm220_vm15  ;;  %v229_v52 = vadd.s32 %v212_v47, %v200_v40  ;;  %v230_v53 = vadd.s32 %v213_v48, %v201_v41  ;;  %v231_v54 = vadd.s32 %v214_v49, %v202_v44 }
  0x3e   : > { %vm222_vm0 = vmand %vm217_vm4, %vm220_vm15  ;;  %v225_v51 = vsel %vm221_vm7, 1, %v695_v14  ;;  %v232_v56 = vadd.s32 %v215_v50, %v203_v46  ;;  %v237_v57 = vperm.slane %v800_v2, 3  ;;  %v238_v58 = vperm.slane %v802_v3, 3 }
  0x3f   : > { %vm223_vm8 = vmand %vm218_vm5, %vm220_vm15  ;;  %v226_v55 = vsel %vm222_vm0, 1, %v695_v14  ;;  %v233_v60 = vadd.s32 %v229_v52, %v225_v51  ;;  %v239_v62 = vperm.slane %v804_v4, 3  ;;  %vm286_vm10 = vcmp.gt.s32.totalorder %v798_v1, 4 }
  0x40   : > { %vm224_vm9 = vmand %vm219_vm6, %vm220_vm15  ;;  %v227_v59 = vsel %vm223_vm8, 1, %v695_v14  ;;  %v234_v61 = vadd.s32 %v230_v53, %v226_v55  ;;  %v240_v6 = vperm.slane %v808_v5, 3  ;;  %vm241_vm11 = vcmp.lt.f32.partialorder %v237_v57, %v800_v2 }
  0x41   : > { %v228_v63 = vsel %vm224_vm9, 1, %v695_v14  ;;  %v235_v0 = vadd.s32 %v231_v54, %v227_v59  ;;  %vm242_vm13 = vcmp.lt.f32.partialorder %v238_v58, %v802_v3  ;;  %vm243_vm15 = vcmp.lt.f32.partialorder %v239_v62, %v804_v4 }
  0x42   : > { %v236_v7 = vadd.s32 %v232_v56, %v228_v63  ;;  %v245_v8 = vsel %vm241_vm11, 1, %v695_v14  ;;  %vm244_vm14 = vcmp.lt.f32.partialorder %v240_v6, %v808_v5  ;;  %v246_v9 = vsel %vm242_vm13, 1, %v695_v14 }
  0x43   : > { %v247_v10 = vsel %vm243_vm15, 1, %v695_v14  ;;  %vm249_vm1 = vcmp.eq.f32.partialorder %v237_v57, %v800_v2  ;;  %v248_v11 = vsel %vm244_vm14, 1, %v695_v14  ;;  %vm250_vm2 = vcmp.eq.f32.partialorder %v238_v58, %v802_v3 }
  0x44   : > { %vm251_vm3 = vcmp.eq.f32.partialorder %v239_v62, %v804_v4  ;;  %vm252_vm4 = vcmp.eq.f32.partialorder %v240_v6, %v808_v5  ;;  %vm254_vm5 = vmand %vm249_vm1, %vm253_vm12  ;;  %v262_v13 = vadd.s32 %v245_v8, %v233_v60  ;;  %v263_v15 = vadd.s32 %v246_v9, %v234_v61 }
  0x45   : > { %vm255_vm6 = vmand %vm250_vm2, %vm253_vm12  ;;  %v258_v12 = vsel %vm254_vm5, 1, %v695_v14  ;;  %v264_v16 = vadd.s32 %v247_v10, %v235_v0  ;;  %v265_v18 = vadd.s32 %v248_v11, %v236_v7  ;;  %v270_v19 = vperm.slane %v800_v2, 4 }
  0x46   : > { %vm256_vm7 = vmand %vm251_vm3, %vm253_vm12  ;;  %v259_v17 = vsel %vm255_vm6, 1, %v695_v14  ;;  %v271_v20 = vperm.slane %v802_v3, 4  ;;  %v266_v22 = vadd.s32 %v262_v13, %v258_v12  ;;  %v272_v24 = vperm.slane %v804_v4, 4 }
  0x47   : > { %vm257_vm0 = vmand %vm252_vm4, %vm253_vm12  ;;  %v260_v21 = vsel %vm256_vm7, 1, %v695_v14  ;;  %v267_v23 = vadd.s32 %v263_v15, %v259_v17  ;;  %v273_v27 = vperm.slane %v808_v5, 4  ;;  %vm274_vm8 = vcmp.lt.f32.partialorder %v270_v19, %v800_v2 }
  0x48   : > { %v261_v25 = vsel %vm257_vm0, 1, %v695_v14  ;;  %v268_v26 = vadd.s32 %v264_v16, %v260_v21  ;;  %vm275_vm9 = vcmp.lt.f32.partialorder %v271_v20, %v802_v3  ;;  %vm276_vm11 = vcmp.lt.f32.partialorder %v272_v24, %v804_v4 }
  0x49   : > { %v269_v28 = vadd.s32 %v265_v18, %v261_v25  ;;  %v278_v29 = vsel %vm274_vm8, 1, %v695_v14  ;;  %vm277_vm12 = vcmp.lt.f32.partialorder %v273_v27, %v808_v5  ;;  %v279_v30 = vsel %vm275_vm9, 1, %v695_v14 }
  0x4a   : > { %v280_v31 = vsel %vm276_vm11, 1, %v695_v14  ;;  %vm282_vm13 = vcmp.eq.f32.partialorder %v270_v19, %v800_v2  ;;  %v281_v32 = vsel %vm277_vm12, 1, %v695_v14  ;;  %vm283_vm15 = vcmp.eq.f32.partialorder %v271_v20, %v802_v3 }
  0x4b   : > { %vm284_vm14 = vcmp.eq.f32.partialorder %v272_v24, %v804_v4  ;;  %vm285_vm1 = vcmp.eq.f32.partialorder %v273_v27, %v808_v5  ;;  %vm287_vm2 = vmand %vm282_vm13, %vm286_vm10  ;;  %v295_v34 = vadd.s32 %v278_v29, %v266_v22  ;;  %v296_v35 = vadd.s32 %v279_v30, %v267_v23 }
  0x4c   : > { %vm288_vm3 = vmand %vm283_vm15, %vm286_vm10  ;;  %v291_v33 = vsel %vm287_vm2, 1, %v695_v14  ;;  %v297_v36 = vadd.s32 %v280_v31, %v268_v26  ;;  %v298_v38 = vadd.s32 %v281_v32, %v269_v28  ;;  %v303_v39 = vperm.slane %v800_v2, 5 }
  0x4d   : > { %vm289_vm4 = vmand %vm284_vm14, %vm286_vm10  ;;  %v292_v37 = vsel %vm288_vm3, 1, %v695_v14  ;;  %v304_v40 = vperm.slane %v802_v3, 5  ;;  %v299_v42 = vadd.s32 %v295_v34, %v291_v33  ;;  %v305_v44 = vperm.slane %v804_v4, 5 }
  0x4e   : > { %vm290_vm5 = vmand %vm285_vm1, %vm286_vm10  ;;  %v293_v41 = vsel %vm289_vm4, 1, %v695_v14  ;;  %v300_v43 = vadd.s32 %v296_v35, %v292_v37  ;;  %v306_v47 = vperm.slane %v808_v5, 5  ;;  %vm307_vm6 = vcmp.lt.f32.partialorder %v303_v39, %v800_v2 }
  0x4f   : > { %v294_v45 = vsel %vm290_vm5, 1, %v695_v14  ;;  %v301_v46 = vadd.s32 %v297_v36, %v293_v41  ;;  %vm308_vm7 = vcmp.lt.f32.partialorder %v304_v40, %v802_v3  ;;  %vm309_vm0 = vcmp.lt.f32.partialorder %v305_v44, %v804_v4 }
  0x50   : > { %v302_v48 = vadd.s32 %v298_v38, %v294_v45  ;;  %v311_v49 = vsel %vm307_vm6, 1, %v695_v14  ;;  %vm310_vm10 = vcmp.lt.f32.partialorder %v306_v47, %v808_v5  ;;  %v312_v50 = vsel %vm308_vm7, 1, %v695_v14 }
  0x51   : > { %v313_v51 = vsel %vm309_vm0, 1, %v695_v14  ;;  %vm315_vm8 = vcmp.eq.f32.partialorder %v303_v39, %v800_v2  ;;  %v314_v52 = vsel %vm310_vm10, 1, %v695_v14  ;;  %vm316_vm9 = vcmp.eq.f32.partialorder %v304_v40, %v802_v3 }
  0x52   : > { %vm968_vm11 = vcmp.eq.f32.partialorder %v305_v44, %v804_v4  ;;  %vm973_vm12 = vcmp.eq.f32.partialorder %v306_v47, %v808_v5  ;;  %vm319_vm13 = vcmp.gt.s32.totalorder %v798_v1, 5  ;;  %v328_v55 = vadd.s32 %v311_v49, %v299_v42 }
  0x53   : > { %v329_v56 = vadd.s32 %v312_v50, %v300_v43  ;;  %v330_v57 = vadd.s32 %v313_v51, %v301_v46  ;;  %vm320_vm15 = vmand %vm315_vm8, %vm319_vm13  ;;  %v331_v58 = vadd.s32 %v314_v52, %v302_v48  ;;  %v336_v59 = vperm.slane %v800_v2, 6 }
  0x54   : > { %v337_v60 = vperm.slane %v802_v3, 6  ;;  %v338_v61 = vperm.slane %v804_v4, 6  ;;  %vm321_vm14 = vmand %vm316_vm9, %vm319_vm13  ;;  %v324_v62 = vsel %vm320_vm15, 1, %v695_v14  ;;  %v339_v63 = vperm.slane %v808_v5, 6 }
  0x55   : > { %vm352_vm1 = vcmp.gt.s32.totalorder %v798_v1, 6  ;;  %v369_v0 = vperm.slane %v800_v2, 7  ;;  %vm322_vm2 = vmand %vm968_vm11, %vm319_vm13  ;;  %v325_v6 = vsel %vm321_vm14, 1, %v695_v14  ;;  %v332_v7 = vadd.s32 %v328_v55, %v324_v62 }
  0x56   : > { %vm340_vm3 = vcmp.lt.f32.partialorder %v336_v59, %v800_v2  ;;  %vm341_vm4 = vcmp.lt.f32.partialorder %v337_v60, %v802_v3  ;;  %vm323_vm5 = vmand %vm973_vm12, %vm319_vm13  ;;  %v326_v8 = vsel %vm322_vm2, 1, %v695_v14  ;;  %v333_v9 = vadd.s32 %v329_v56, %v325_v6 }
  0x57   : > { %vm342_vm6 = vcmp.lt.f32.partialorder %v338_v61, %v804_v4  ;;  %vm343_vm7 = vcmp.lt.f32.partialorder %v339_v63, %v808_v5  ;;  %v327_v10 = vsel %vm323_vm5, 1, %v695_v14  ;;  %v334_v11 = vadd.s32 %v330_v57, %v326_v8 }
  0x58   : > { %v344_v12 = vsel %vm340_vm3, 1, %v695_v14  ;;  %v345_v13 = vsel %vm341_vm4, 1, %v695_v14  ;;  %v335_v15 = vadd.s32 %v331_v58, %v327_v10  ;;  %v346_v16 = vsel %vm342_vm6, 1, %v695_v14 }
  0x59   : > { %v347_v17 = vsel %vm343_vm7, 1, %v695_v14  ;;  %vm348_vm0 = vcmp.eq.f32.partialorder %v336_v59, %v800_v2  ;;  %vm349_vm10 = vcmp.eq.f32.partialorder %v337_v60, %v802_v3  ;;  %vm350_vm8 = vcmp.eq.f32.partialorder %v338_v61, %v804_v4 }
  0x5a   : > { %vm351_vm9 = vcmp.eq.f32.partialorder %v339_v63, %v808_v5  ;;  %vm353_vm11 = vmand %vm348_vm0, %vm352_vm1  ;;  %v361_v18 = vadd.s32 %v344_v12, %v332_v7  ;;  %v362_v20 = vadd.s32 %v345_v13, %v333_v9  ;;  %v363_v21 = vadd.s32 %v346_v16, %v334_v11 }
  0x5b   : > { %vm354_vm12 = vmand %vm349_vm10, %vm352_vm1  ;;  %v357_v19 = vsel %vm353_vm11, 1, %v695_v14  ;;  %v364_v22 = vadd.s32 %v347_v17, %v335_v15  ;;  %v370_v25 = vperm.slane %v802_v3, 7  ;;  %v371_v26 = vperm.slane %v804_v4, 7 }
  0x5c   : > { %vm355_vm13 = vmand %vm350_vm8, %vm352_vm1  ;;  %v358_v23 = vsel %vm354_vm12, 1, %v695_v14  ;;  %v365_v24 = vadd.s32 %v361_v18, %v357_v19  ;;  %v372_v29 = vperm.slane %v808_v5, 7  ;;  %vm373_vm14 = vcmp.lt.f32.partialorder %v369_v0, %v800_v2 }
  0x5d   : > { %vm356_vm15 = vmand %vm351_vm9, %vm352_vm1  ;;  %v359_v27 = vsel %vm355_vm13, 1, %v695_v14  ;;  %v366_v28 = vadd.s32 %v362_v20, %v358_v23  ;;  %vm374_vm2 = vcmp.lt.f32.partialorder %v370_v25, %v802_v3  ;;  %vm375_vm3 = vcmp.lt.f32.partialorder %v371_v26, %v804_v4 }
  0x5e   : > { %v360_v30 = vsel %vm356_vm15, 1, %v695_v14  ;;  %v367_v31 = vadd.s32 %v363_v21, %v359_v27  ;;  %vm376_vm4 = vcmp.lt.f32.partialorder %v372_v29, %v808_v5  ;;  %v377_v1 = vsel %vm373_vm14, 1, %v695_v14 }
  0x5f   : > { %v368_v32 = vadd.s32 %v364_v22, %v360_v30  ;;  %v378_v33 = vsel %vm374_vm2, 1, %v695_v14  ;;  %v379_v34 = vsel %vm375_vm3, 1, %v695_v14  ;;  %v380_v35 = vsel %vm376_vm4, 1, %v695_v14 }
  0x60   : > { %v394_v36 = vadd.s32 %v377_v1, %v365_v24  ;;  %v395_v37 = vadd.s32 %v378_v33, %v366_v28  ;;  %v396_v38 = vadd.s32 %v379_v34, %v367_v31  ;;  %vm438_vm0 = vcmask 1041409  }
  0x61   : > { %v397_v39 = vadd.s32 %v380_v35, %v368_v32  ;;  %vm440_vm10 = vcmask 1042434   ;;  %vm442_vm8 = vcmask 1043459  }
  0x62   : > { %vm402_vm1 = vcmp.eq.s32.totalorder %v394_v36, 3  ;;  %vm403_vm5 = vcmp.eq.s32.totalorder %v395_v37, 3  ;;  %vm404_vm6 = vcmp.eq.s32.totalorder %v396_v38, 3 }
  0x63   : > { %vm405_vm7 = vcmp.eq.s32.totalorder %v397_v39, 3  ;;  %v406_v40 = vsel %vm402_vm1, %v800_v2, 0.0  ;;  %v407_v41 = vsel %vm403_vm5, %v802_v3, 0.0  ;;  %v408_v42 = vsel %vm404_vm6, %v804_v4, 0.0 }
  0x64   : > { %v409_v43 = vsel %vm405_vm7, %v808_v5, 0.0  ;;  %v410_v44 = vrot.slane %v406_v40, 4  ;;  %v416_v14 = vrot.slane %v407_v41, 4  ;;  %v422_v45 = vrot.slane %v408_v42, 4 }
  0x65   : > { %v428_v46 = vrot.slane %v409_v43, 4 }
  0x66   : > { %v411_v47 = vadd.f32 %v410_v44, %v406_v40  ;;  %v417_v48 = vadd.f32 %v416_v14, %v407_v41  ;;  %v423_v49 = vadd.f32 %v422_v45, %v408_v42 }
  0x67   : > { %v429_v50 = vadd.f32 %v428_v46, %v409_v43 }
  0x68   : > { %v412_v51 = vrot.slane %v411_v47, 2  ;;  %v418_v52 = vrot.slane %v417_v48, 2  ;;  %v424_v53 = vrot.slane %v423_v49, 2 }
  0x69   : > { %v430_v2 = vrot.slane %v429_v50, 2 }
  0x6a   : > { %v413_v54 = vadd.f32 %v412_v51, %v411_v47  ;;  %v419_v3 = vadd.f32 %v418_v52, %v417_v48  ;;  %v425_v55 = vadd.f32 %v424_v53, %v423_v49 }
  0x6b   : > { %v431_v4 = vadd.f32 %v430_v2, %v429_v50 }
  0x6c   : > { %v414_v5 = vrot.slane %v413_v54, 1  ;;  %v420_v56 = vrot.slane %v419_v3, 1  ;;  %v426_v57 = vrot.slane %v425_v55, 1 }
  0x6d   : > { %v432_v58 = vrot.slane %v431_v4, 1 }
  0x6e   : > { %v415_v59 = vadd.f32 %v414_v5, %v413_v54  ;;  %v421_v60 = vadd.f32 %v420_v56, %v419_v3  ;;  %v427_v61 = vadd.f32 %v426_v57, %v425_v55 }
  0x6f   : > { %v433_v62 = vadd.f32 %v432_v58, %v431_v4 }
  0x70   : > { %v439_v63 = vsel %vm438_vm0, %v421_v60, %v415_v59 }
  0x71   : > { %v441_v0 = vsel %vm440_vm10, %v427_v61, %v439_v63 }
  0x72   : > { %v443_v6 = vsel %vm442_vm8, %v433_v62, %v441_v0 }
  0x73   : > { %445 = vst [vmem:[%s135_s10] sm:$0xf] %v443_v6 }
  0x74   : > { %651 = shalt.err (!%p648_p7)
}
  0x75   : > { %546 = dma.vmem_to_hbm [thread:$0]  (%p756_p11), %s460_s30, 64, %s462_s2, %s447_s3  }
  0x76 PF: > { %s473_s21 = sand.u32 1, %s678_s6   ;;  %p553_p8 = pnand %p534_p9, %p760_p12 }
  0x77   : > { %s474_s22 = scalar_lea.sflag [#allocation4], %s473_s21 }
  0x78   : > { %p554_p10 = pneg %p553_p8 }
  0x7a   : > { %673 = dma.done.wait (%p554_p10), %s474_s22, 64  }
  0x7b   : > { %675 = vsyncadd (%p554_p10), %s474_s22, 4294967232  ;;  %p14_p1 = scmp.ge.s32.totalorder %s731_s12, 4   ;;  %s1084_s6 = smov %s682_s7 }
  0x7c   : > { %s1085_s7 = smov %s686_s8  ;;  %s1086_s8 = smov %s743_s15 }
  0x7d   : > { %s1087_s9 = smov %s731_s12  ;;  %16 = sbr.rel (!%p14_p1) target bundleno = 5 (0x5), region = 69 }
  0x82   :  { %480 = vsyncpa [#allocation3], 1 }
  0x83   :  { %482 = vsyncpa [#allocation3 + $0x1], 1 }
  0x84   :  { %483 = vsyncpa [#allocation4], 1 }
  0x85   :  { %485 = vsyncpa [#allocation4 + $0x1], 1 }

</bundles_post_ra>
